<compile_context>
chip_gen: v7x
topology: tpu7x:2x2x1
jax: 0.10.0
libtpu: 0.0.40
codegen_flags: <defaults>
</compile_context>

<pallas_src>
import jax
import jax.numpy as jnp
from jax.experimental import pallas as pl
from jax.experimental.pallas import tpu as pltpu

BN_EPS = 0.001
LANE = 128
SUBLANE = 8


def _round_up(x, m):
    return ((x + m - 1) // m) * m


def _pad2d(a, rows, cols):
    r, c = a.shape
    return jnp.pad(a, ((0, rows - r), (0, cols - c)))


def _autoencoder_kernel(
    x_ref,       # (TB, n_in_p)        activations (batch tile)
    w1_ref,      # (n_in_p, n_hid_p)   BN-folded encoder weight 1
    b1_ref,      # (1, n_hid_p)        BN-folded bias 1 (f32)
    w2_ref,      # (n_hid_p, n_out_p)
    b2_ref,      # (1, n_out_p)        (f32)
    wd_ref,      # (n_out_p, n_in_p)   decoder weight (no bias)
    recon_ref,   # (TB, n_in_p)   out
    z_ref,       # (TB, n_out_p)  out
):
    cdt = w1_ref.dtype  # matmul operand dtype (f32 or bf16); accumulation is f32

    x = x_ref[...]

    # Linear1 (+ folded BatchNorm) -> ReLU, elementwise kept in f32.
    h = jnp.dot(x, w1_ref[...], preferred_element_type=jnp.float32) + b1_ref[...]
    h = jnp.maximum(h, 0.0)

    # Linear2 -> z
    z = jnp.dot(h.astype(cdt), w2_ref[...], preferred_element_type=jnp.float32) + b2_ref[...]
    z_ref[...] = z.astype(z_ref.dtype)

    # Decoder Linear (no bias) -> reconstruction
    recon = jnp.dot(z.astype(cdt), wd_ref[...], preferred_element_type=jnp.float32)
    recon_ref[...] = recon.astype(recon_ref.dtype)


def autoencoder_forward(x, params, *, use_bf16=True, batch_tile=256):
    """x: (B, n_input) float32. params: PyTorch-style weights (out, in). Returns (recon, z)."""
    B, n_input = x.shape
    n_hidden = params["w1"].shape[0]
    n_output = params["w2"].shape[0]

    # ---- fold eval-mode BatchNorm into Linear1 (exact) ----
    scale = params["bn_gamma"] * jax.lax.rsqrt(params["bn_var"] + BN_EPS)   # (n_hidden,)
    w1_f = (params["w1"] * scale[:, None]).T                                # (n_input, n_hidden)
    b1_f = (params["b1"] - params["bn_mean"]) * scale + params["bn_beta"]   # (n_hidden,)
    w2_t = params["w2"].T                                                   # (n_hidden, n_output)
    wd_t = params["wd"].T                                                   # (n_output, n_input)

    # ---- pad feature dims to lane multiples, batch to the tile ----
    n_in_p = _round_up(n_input, LANE)
    n_hid_p = _round_up(n_hidden, LANE)
    n_out_p = _round_up(n_output, LANE)
    TB = batch_tile if B >= batch_tile else max(SUBLANE, _round_up(B, SUBLANE))
    B_p = _round_up(B, TB)

    cdt = jnp.bfloat16 if use_bf16 else jnp.float32

    x_p = _pad2d(x, B_p, n_in_p).astype(cdt)
    w1_p = _pad2d(w1_f, n_in_p, n_hid_p).astype(cdt)
    b1_p = _pad2d(b1_f.reshape(1, n_hidden), 1, n_hid_p)                    # f32
    w2_p = _pad2d(w2_t, n_hid_p, n_out_p).astype(cdt)
    b2_p = _pad2d(params["b2"].reshape(1, n_output), 1, n_out_p)            # f32
    wd_p = _pad2d(wd_t, n_out_p, n_in_p).astype(cdt)

    # ---- VMEM budget: resident weights + double-buffered per-tile activations ----
    wb = 2 if use_bf16 else 4
    weight_bytes = (n_in_p * n_hid_p + n_hid_p * n_out_p + n_out_p * n_in_p) * wb \
        + (n_hid_p + n_out_p) * 4
    act_bytes = 2 * TB * (n_in_p * wb + n_in_p * 4 + n_out_p * 4)
    vmem_limit = int(min(max(2 * (weight_bytes + act_bytes), 32 << 20), 48 << 20))

    grid = (B_p // TB,)
    const = lambda i: (0, 0)   # weights resident across batch tiles
    batch = lambda i: (i, 0)   # activations / outputs streamed per tile

    recon_p, z_p = pl.pallas_call(
        _autoencoder_kernel,
        out_shape=(
            jax.ShapeDtypeStruct((B_p, n_in_p), jnp.float32),
            jax.ShapeDtypeStruct((B_p, n_out_p), jnp.float32),
        ),
        grid=grid,
        in_specs=[
            pl.BlockSpec((TB, n_in_p), batch),
            pl.BlockSpec((n_in_p, n_hid_p), const),
            pl.BlockSpec((1, n_hid_p), const),
            pl.BlockSpec((n_hid_p, n_out_p), const),
            pl.BlockSpec((1, n_out_p), const),
            pl.BlockSpec((n_out_p, n_in_p), const),
        ],
        out_specs=(
            pl.BlockSpec((TB, n_in_p), batch),
            pl.BlockSpec((TB, n_out_p), batch),
        ),
        compiler_params=pltpu.CompilerParams(
            dimension_semantics=("parallel",),     # megacore-shardable batch axis (v7x)
            vmem_limit_bytes=vmem_limit,
        ),
    )(x_p, w1_p, b1_p, w2_p, b2_p, wd_p)

    # Slice padding back off.
    return recon_p[:B, :n_input], z_p[:B, :n_output]


def init_params(key, n_input, n_hidden, n_output):
    """Deterministic synthetic parameters (PyTorch-style weight shapes: (out, in))."""
    k1, k2, k3, k4, k5 = jax.random.split(key, 5)
    s1 = 1.0 / jnp.sqrt(n_input)
    s2 = 1.0 / jnp.sqrt(n_hidden)
    s3 = 1.0 / jnp.sqrt(n_output)
    return {
        "w1": jax.random.uniform(k1, (n_hidden, n_input), jnp.float32, -s1, s1),
        "b1": jax.random.uniform(k2, (n_hidden,), jnp.float32, -s1, s1),
        "bn_gamma": jnp.ones((n_hidden,), jnp.float32),
        "bn_beta": jnp.zeros((n_hidden,), jnp.float32),
        "bn_mean": jnp.zeros((n_hidden,), jnp.float32),
        "bn_var": jnp.ones((n_hidden,), jnp.float32),
        "w2": jax.random.uniform(k3, (n_output, n_hidden), jnp.float32, -s2, s2),
        "b2": jax.random.uniform(k4, (n_output,), jnp.float32, -s2, s2),
        "wd": jax.random.uniform(k5, (n_input, n_output), jnp.float32, -s3, s3),
    }


def _reference_forward(x, p):
    """Pure-JAX reference (eval-mode BatchNorm, Dropout = identity)."""
    h = x @ p["w1"].T + p["b1"]
    h = (h - p["bn_mean"]) / jnp.sqrt(p["bn_var"] + BN_EPS) * p["bn_gamma"] + p["bn_beta"]
    h = jnp.maximum(h, 0.0)
    z = h @ p["w2"].T + p["b2"]
    recon = z @ p["wd"].T
    return recon, z


if __name__ == "__main__":
    key = jax.random.PRNGKey(0)
    kx, kp = jax.random.split(key)

    B, n_input, n_hidden, n_output = 512, 64, 32, 16   # 2 batch tiles of 256
    x = jax.random.normal(kx, (B, n_input), dtype=jnp.float32)
    params = init_params(kp, n_input, n_hidden, n_output)

    recon_ref, z_ref = _reference_forward(x, params)

    # f32 operands: strict check.
    recon32, z32 = autoencoder_forward(x, params, use_bf16=False)
    jax.block_until_ready((recon32, z32))
    assert recon32.shape == (B, n_input) and z32.shape == (B, n_output)
    assert jnp.allclose(recon32, recon_ref, atol=5e-4, rtol=5e-4)
    assert jnp.allclose(z32, z_ref, atol=5e-4, rtol=5e-4)

    # bf16 operands (f32 accumulation): relaxed tolerance.
    recon16, z16 = autoencoder_forward(x, params, use_bf16=True)
    jax.block_until_ready((recon16, z16))
    assert recon16.shape == (B, n_input) and z16.shape == (B, n_output)
    assert jnp.allclose(recon16, recon_ref, atol=5e-2, rtol=5e-2)
    assert jnp.allclose(z16, z_ref, atol=5e-2, rtol=5e-2)

    print("KERNEL_OK")
</pallas_src>

<mosaic_0001>
module attributes {stable_mosaic.version = 11 : i64} {
  func.func @_autoencoder_kernel(%arg0: i32, %arg1: memref<256x128xf32, #tpu.memory_space<vmem>>, %arg2: memref<128x128xf32, #tpu.memory_space<vmem>>, %arg3: memref<1x128xf32, #tpu.memory_space<vmem>>, %arg4: memref<128x128xf32, #tpu.memory_space<vmem>>, %arg5: memref<1x128xf32, #tpu.memory_space<vmem>>, %arg6: memref<128x128xf32, #tpu.memory_space<vmem>>, %arg7: memref<256x128xf32, #tpu.memory_space<vmem>>, %arg8: memref<256x128xf32, #tpu.memory_space<vmem>>) attributes {dimension_semantics = [#tpu.dimension_semantics<parallel>], iteration_bounds = array<i64: 2>, scalar_prefetch = 0 : i64, scratch_operands = 0 : i64, tpu.core_type = #tpu.core_type<tc>, window_params = [{transform_indices = @transform_0, window_bounds = array<i64: 256, 128>}, {pipeline_mode = #tpu.pipeline_mode<synchronous>, transform_indices = @transform_1, window_bounds = array<i64: 128, 128>}, {pipeline_mode = #tpu.pipeline_mode<synchronous>, transform_indices = @transform_2, window_bounds = array<i64: 1, 128>}, {pipeline_mode = #tpu.pipeline_mode<synchronous>, transform_indices = @transform_3, window_bounds = array<i64: 128, 128>}, {pipeline_mode = #tpu.pipeline_mode<synchronous>, transform_indices = @transform_4, window_bounds = array<i64: 1, 128>}, {pipeline_mode = #tpu.pipeline_mode<synchronous>, transform_indices = @transform_5, window_bounds = array<i64: 128, 128>}, {transform_indices = @transform_6, window_bounds = array<i64: 256, 128>}, {transform_indices = @transform_7, window_bounds = array<i64: 256, 128>}]} {
    %c0 = arith.constant 0 : index
    %c0_0 = arith.constant 0 : index
    %0 = vector.load %arg1[%c0, %c0_0] : memref<256x128xf32, #tpu.memory_space<vmem>>, vector<256x128xf32>
    %c0_1 = arith.constant 0 : index
    %c0_2 = arith.constant 0 : index
    %1 = vector.load %arg2[%c0_1, %c0_2] : memref<128x128xf32, #tpu.memory_space<vmem>>, vector<128x128xf32>
    %cst = arith.constant dense<0.000000e+00> : vector<256x128xf32>
    %2 = tpu.matmul %0, %1, %cst {dimension_numbers = #tpu.dot_dimension_numbers<[1], [0], [0], [1], [0, 0, 1, 1], [], []>} : vector<256x128xf32>, vector<128x128xf32>, vector<256x128xf32> -> vector<256x128xf32>
    %c0_3 = arith.constant 0 : index
    %c0_4 = arith.constant 0 : index
    %3 = vector.load %arg3[%c0_3, %c0_4] : memref<1x128xf32, #tpu.memory_space<vmem>>, vector<1x128xf32>
    %4 = vector.broadcast %3 : vector<1x128xf32> to vector<256x128xf32>
    %5 = arith.addf %2, %4 : vector<256x128xf32>
    %cst_5 = arith.constant 0.000000e+00 : f32
    %6 = vector.broadcast %cst_5 : f32 to vector<256x128xf32>
    %7 = arith.maximumf %5, %6 : vector<256x128xf32>
    %c0_6 = arith.constant 0 : index
    %c0_7 = arith.constant 0 : index
    %8 = vector.load %arg4[%c0_6, %c0_7] : memref<128x128xf32, #tpu.memory_space<vmem>>, vector<128x128xf32>
    %cst_8 = arith.constant dense<0.000000e+00> : vector<256x128xf32>
    %9 = tpu.matmul %7, %8, %cst_8 {dimension_numbers = #tpu.dot_dimension_numbers<[1], [0], [0], [1], [0, 0, 1, 1], [], []>} : vector<256x128xf32>, vector<128x128xf32>, vector<256x128xf32> -> vector<256x128xf32>
    %c0_9 = arith.constant 0 : index
    %c0_10 = arith.constant 0 : index
    %10 = vector.load %arg5[%c0_9, %c0_10] : memref<1x128xf32, #tpu.memory_space<vmem>>, vector<1x128xf32>
    %11 = vector.broadcast %10 : vector<1x128xf32> to vector<256x128xf32>
    %12 = arith.addf %9, %11 : vector<256x128xf32>
    %c0_11 = arith.constant 0 : index
    %c0_12 = arith.constant 0 : index
    %13 = vector.load %arg8[%c0_11, %c0_12] : memref<256x128xf32, #tpu.memory_space<vmem>>, vector<256x128xf32>
    tpu.vector_store %arg8[%c0_11, %c0_12], %12 {strides = array<i32>} : memref<256x128xf32, #tpu.memory_space<vmem>>, vector<256x128xf32>,
    %c0_13 = arith.constant 0 : index
    %c0_14 = arith.constant 0 : index
    %14 = vector.load %arg6[%c0_13, %c0_14] : memref<128x128xf32, #tpu.memory_space<vmem>>, vector<128x128xf32>
    %cst_15 = arith.constant dense<0.000000e+00> : vector<256x128xf32>
    %15 = tpu.matmul %12, %14, %cst_15 {dimension_numbers = #tpu.dot_dimension_numbers<[1], [0], [0], [1], [0, 0, 1, 1], [], []>} : vector<256x128xf32>, vector<128x128xf32>, vector<256x128xf32> -> vector<256x128xf32>
    %c0_16 = arith.constant 0 : index
    %c0_17 = arith.constant 0 : index
    %16 = vector.load %arg7[%c0_16, %c0_17] : memref<256x128xf32, #tpu.memory_space<vmem>>, vector<256x128xf32>
    tpu.vector_store %arg7[%c0_16, %c0_17], %15 {strides = array<i32>} : memref<256x128xf32, #tpu.memory_space<vmem>>, vector<256x128xf32>,
    return
  }
  func.func @transform_0(%arg0: i32) -> (i32, i32) {
    %c0_i32 = arith.constant 0 : i32
    %c0_i32_0 = arith.constant 0 : i32
    return %arg0, %c0_i32 : i32, i32
  }
  func.func @transform_1(%arg0: i32) -> (i32, i32) {
    %c0_i32 = arith.constant 0 : i32
    %c0_i32_0 = arith.constant 0 : i32
    %c0_i32_1 = arith.constant 0 : i32
    return %c0_i32, %c0_i32_0 : i32, i32
  }
  func.func @transform_2(%arg0: i32) -> (i32, i32) {
    %c0_i32 = arith.constant 0 : i32
    %c0_i32_0 = arith.constant 0 : i32
    %c0_i32_1 = arith.constant 0 : i32
    return %c0_i32, %c0_i32_0 : i32, i32
  }
  func.func @transform_3(%arg0: i32) -> (i32, i32) {
    %c0_i32 = arith.constant 0 : i32
    %c0_i32_0 = arith.constant 0 : i32
    %c0_i32_1 = arith.constant 0 : i32
    return %c0_i32, %c0_i32_0 : i32, i32
  }
  func.func @transform_4(%arg0: i32) -> (i32, i32) {
    %c0_i32 = arith.constant 0 : i32
    %c0_i32_0 = arith.constant 0 : i32
    %c0_i32_1 = arith.constant 0 : i32
    return %c0_i32, %c0_i32_0 : i32, i32
  }
  func.func @transform_5(%arg0: i32) -> (i32, i32) {
    %c0_i32 = arith.constant 0 : i32
    %c0_i32_0 = arith.constant 0 : i32
    %c0_i32_1 = arith.constant 0 : i32
    return %c0_i32, %c0_i32_0 : i32, i32
  }
  func.func @transform_6(%arg0: i32) -> (i32, i32) {
    %c0_i32 = arith.constant 0 : i32
    %c0_i32_0 = arith.constant 0 : i32
    return %arg0, %c0_i32 : i32, i32
  }
  func.func @transform_7(%arg0: i32) -> (i32, i32) {
    %c0_i32 = arith.constant 0 : i32
    %c0_i32_0 = arith.constant 0 : i32
    return %arg0, %c0_i32 : i32, i32
  }
}

</mosaic_0001>

<bundles_post_ra>
// kernel: tpu_custom_call.1
= control target key start
LH: loop header
LB: loop body
LE: loop exit
PB: predicated region body
PF: predicated region fallthrough
CT: control target
= control target key end

     0   :  { %13 = vsyncpa [#allocation3], 0  ;;  %s2794_s0 = inlined_call_operand.hbm [shape: f32[512,128], index: 0, kind: input, shape index: {}]   ;;  %s2795_s1 = inlined_call_operand.hbm [shape: f32[128,128], index: 1, kind: input, shape index: {}]   ;;  %s2796_s2 = inlined_call_operand.vmem [shape: f32[1,128], index: 2, kind: input, shape index: {}]   ;;  %s2797_s3 = inlined_call_operand.hbm [shape: f32[128,128], index: 3, kind: input, shape index: {}]   ;;  %s2798_s4 = inlined_call_operand.vmem [shape: f32[1,128], index: 4, kind: input, shape index: {}]   ;;  %s2799_s5 = inlined_call_operand.hbm [shape: f32[128,128], index: 5, kind: input, shape index: {}]   ;;  %s2800_s6 = inlined_call_operand.hbm [shape: f32[512,128], index: 6, kind: output, shape index: {0}]   ;;  %s2801_s7 = inlined_call_operand.hbm [shape: f32[512,128], index: 7, kind: output, shape index: {1}]  }
   0x1   :  { %15 = vsyncpa [#allocation3 + $0x1], 0 }
   0x2   :  { %16 = vsyncpa [#allocation6], 0 }
   0x3   :  { %17 = vsyncpa [#allocation9], 0 }
   0x4   :  { %18 = vsyncpa [#allocation4], 0 }
   0x5   :  { %20 = vsyncpa [#allocation4 + $0x1], 0 }
   0x6   :  { %21 = vsyncpa [#allocation12], 0 }
   0x7   :  { %23 = vsyncpa [#allocation12 + $0x1], 0  ;;  %s2272_s24 = smov 0   ;;  %s2274_s25 = smov 0  }
   0x8   :  { %s2276_s26 = smov 0   ;;  %s2278_s27 = smov 0  }
   0x9 LB: > { %s2293_s28 = sadd.s32 4294967295, %s2220_s27   ;;  %s1389_s29 = sadd.s32 4294967294, %s2220_s27   ;;  %s2220_s27 = sphi %s2278_s27, %s2827_s27   ;;  %s2216_s26 = sphi %s2276_s26, %s2826_s26   ;;  %s2212_s25 = sphi %s2274_s25, %s2825_s25   ;;  %s2208_s24 = sphi %s2272_s24, %s2824_s24  }
   0xa   : > { %p49_p0 = scmp.ne.s32.totalorder %s2212_s25, %s2208_s24  ;;  %p2802_p1 = scmp.eq.s32.totalorder %s2293_s28, 0 }
   0xb   : > { %p184_p3 = scmp.eq.s32.totalorder %s1389_s29, 1  ;;  %p1390_p5 = scmp.ge.s32.totalorder %s2220_s27, 1 }
   0xc   : > { %p2302_p4 = por %p2802_p1, %p49_p0  ;;  %p217_p7 = scmp.lt.s32.totalorder %s2220_s27, 3 }
   0xd   : > { %p2307_p6 = por %p184_p3, %p49_p0  ;;  %s2222_s10 = smov [#allocation5]  }
   0xe   : > { %s2806_s30 = scalar_select %p2302_p4, 1, 0 }
   0xf   : > { %s2807_s8 = scalar_select %p2307_p6, 1, 0 }
  0x10   : > { %p2312_p8 = pnand %p1390_p5, %p217_p7  ;;  %s229_s11 = sshll.u32 %s2222_s10, 4  ;;  %s2316_s11 = int_to_ptr.vmem [resolvable:$true] %s229_s11 }
  0x11   : > { %2808 = sst [smem:[#allocation18_spill]] %s2807_s8  ;;  %s2223_s13 = smov [#allocation7]  }
  0x12   : > { %s2809_s9 = scalar_select %p2312_p8, 1, 0 }
  0x13   : > { %p1932_p9 = pneg %p2312_p8  ;;  %s245_s14 = sshll.u32 %s2223_s13, 4  ;;  %s2327_s14 = int_to_ptr.vmem [resolvable:$true] %s245_s14 }
  0x14   : > { %s2224_s15 = smov [#allocation8]   ;;  %s2000_s19 = scalar_lea.hbm %s2795_s1, 2048 }
  0x15   : > { %p2323_p11 = pnand %p1932_p9, %p2802_p1  ;;  %s2329_s16 = sshll.u32 %s2224_s15, 4  ;;  %s262_s16 = int_to_ptr.vmem [resolvable:$true] %s2329_s16 }
  0x16   : > { %p2001_p12 = scmp.ne.s32.totalorder %s2795_s1, %s2000_s19  ;;  %p2007_p5 = scmp.lt.u32.totalorder %s2000_s19, %s2795_s1 }
  0x17   : > { %p2339_p13 = pneg %p2323_p11 }
  0x19   : > { %p2003_p0 = pnand %p2339_p13, %p2001_p12 }
  0x1b   : > { %p2004_p3 = pneg %p2003_p0 }
  0x1d   : > { %p2009_p7 = pnand %p2007_p5, %p2004_p3 }
  0x1f   : > { %2012 = shalt.err (!%p2009_p7)
}
  0x20   : > { %s2013_s10 = scalar_lea.vmem %s2316_s11, 2048  ;;  %p2021_p2 = scmp.lt.s32.totalorder %s2316_s11, %s2316_s11 }
  0x21   : > { %p2014_p9 = scmp.ne.s32.totalorder %s2316_s11, %s2013_s10  ;;  %p2022_p6 = scmp.lt.s32.totalorder %s2013_s10, %s2013_s10 }
  0x23   : > { %p2016_p10 = pnand %p2014_p9, %p2339_p13  ;;  %p2023_p12 = por %p2022_p6, %p2021_p2 }
  0x25   : > { %p2017_p1 = pneg %p2016_p10 }
  0x27   : > { %p2024_p0 = pnand %p2023_p12, %p2017_p1 }
  0x29   : > { %2027 = shalt.err (!%p2024_p0)
}
  0x2a   : > { %s2225_s13 = smov 128   ;;  %s2226_s15 = smov 8  }
  0x2b   : > { %1935 = dma.hbm_to_vmem [thread:$0]  (!%p2323_p11), %s2795_s1, 2048, %s2316_s11, [#allocation6], %s2225_s13, %s2225_s13, %s2226_s15  }
  0x2c   : > { %s2028_s21 = scalar_lea.hbm %s2797_s3, 2048 }
  0x2d   : > { %p2029_p1 = scmp.ne.s32.totalorder %s2797_s3, %s2028_s21  ;;  %p2035_p10 = scmp.lt.u32.totalorder %s2028_s21, %s2797_s3 }
  0x2f   : > { %p2031_p2 = pnand %p2029_p1, %p2339_p13 }
  0x31   : > { %p2032_p6 = pneg %p2031_p2 }
  0x33   : > { %p2037_p3 = pnand %p2035_p10, %p2032_p6 }
  0x35   : > { %2040 = shalt.err (!%p2037_p3)
}
  0x36   : > { %s2041_s11 = scalar_lea.vmem %s2327_s14, 2048  ;;  %p2049_p12 = scmp.lt.s32.totalorder %s2327_s14, %s2327_s14 }
  0x37   : > { %p2042_p5 = scmp.ne.s32.totalorder %s2327_s14, %s2041_s11  ;;  %p2050_p0 = scmp.lt.s32.totalorder %s2041_s11, %s2041_s11 }
  0x39   : > { %p2044_p7 = pnand %p2042_p5, %p2339_p13  ;;  %p2051_p1 = por %p2050_p0, %p2049_p12 }
  0x3b   : > { %p2045_p9 = pneg %p2044_p7 }
  0x3d   : > { %p2052_p2 = pnand %p2051_p1, %p2045_p9 }
  0x3f   : > { %2055 = shalt.err (!%p2052_p2)
}
  0x40   : > { %1938 = dma.hbm_to_vmem [thread:$0]  (!%p2323_p11), %s2797_s3, 2048, %s2327_s14, [#allocation6], %s2225_s13, %s2225_s13, %s2226_s15  }
  0x41   : > { %s2056_s20 = scalar_lea.hbm %s2799_s5, 2048 }
  0x42   : > { %p2057_p6 = scmp.ne.s32.totalorder %s2799_s5, %s2056_s20  ;;  %p2063_p5 = scmp.lt.u32.totalorder %s2056_s20, %s2799_s5 }
  0x44   : > { %p2059_p10 = pnand %p2057_p6, %p2339_p13 }
  0x46   : > { %p2060_p3 = pneg %p2059_p10 }
  0x48   : > { %p2065_p7 = pnand %p2063_p5, %p2060_p3 }
  0x4a   : > { %2068 = shalt.err (!%p2065_p7)
}
  0x4b   : > { %s2069_s11 = scalar_lea.vmem %s262_s16, 2048  ;;  %p2077_p1 = scmp.lt.s32.totalorder %s262_s16, %s262_s16 }
  0x4c   : > { %p2070_p9 = scmp.ne.s32.totalorder %s262_s16, %s2069_s11  ;;  %p2078_p2 = scmp.lt.s32.totalorder %s2069_s11, %s2069_s11 }
  0x4e   : > { %p2072_p12 = pnand %p2070_p9, %p2339_p13  ;;  %p2079_p4 = por %p2078_p2, %p2077_p1 }
  0x50   : > { %p2073_p0 = pneg %p2072_p12 }
  0x52   : > { %p2080_p8 = pnand %p2079_p4, %p2073_p0 }
  0x54   : > { %2083 = shalt.err (!%p2080_p8)
}
  0x55   : > { %1941 = dma.hbm_to_vmem [thread:$0]  (!%p2323_p11), %s2799_s5, 2048, %s262_s16, [#allocation9], %s2225_s13, %s2225_s13, %s2226_s15  }
  0x56   : > { %s2412_s22 = sadd.s32 1, %s2220_s27   ;;  %s36_s17 = sadd.s32 1, %s2216_s26 }
  0x57   : > { %s33_s12 = ssub.s32 %s2220_s27, %s2412_s22  ;;  %p43_p8 = scmp.ne.s32.totalorder %s2216_s26, %s2212_s25 }
  0x58   : > { %p34_p4 = scmp.eq.s32.totalorder %s33_s12, 0  ;;  %p44_p13 = scmp.eq.s32.totalorder %s2220_s27, 0 }
  0x59   : > { %p1956_p6 = scmp.lt.s32.totalorder %s2220_s27, 2  ;;  %p2812_p3 = scmp.eq.s32.totalorder %s2293_s28, 1 }
  0x5a   : > { %s2422_s18 = scalar_select %p34_p4, %s2216_s26, %s36_s17  }
  0x5b   : > { %p45_p10 = por %p44_p13, %p43_p8  ;;  %p2426_p5 = por %p2812_p3, %p43_p8 }
  0x5c   : > { %s275_s20 = sand.u32 1, %s2216_s26   ;;  %s1415_s21 = sshll.u32 %s2220_s27, 12 }
  0x5d   : > { %s1395_s16 = sshll.u32 %s275_s20, 8  ;;  %s2435_s10 = scalar_lea.hbm %s2794_s0, %s1415_s21 }
  0x5e   : > { %s279_s11 = scalar_lea.vmem [#allocation2], %s1395_s16  ;;  %p2437_p11 = pnand %p1956_p6, %p45_p10 }
  0x5f   : > { %s286_s14 = sshll.u32 %s279_s11, 4  ;;  %s2443_s12 = scalar_lea.sflag [#allocation3], %s275_s20  ;;  %s2441_s14 = int_to_ptr.vmem [resolvable:$true] %s286_s14 }
  0x60   : > { %s2084_s17 = scalar_lea.hbm %s2435_s10, 4096  ;;  %p2086_p9 = pneg %p2437_p11 }
  0x61   : > { %p2085_p7 = scmp.ne.s32.totalorder %s2435_s10, %s2084_s17  ;;  %s2089_s23 = scalar_lea.hbm %s2794_s0, 8192 }
  0x62   : > { %p2090_p1 = scmp.lt.u32.totalorder %s2435_s10, %s2794_s0  ;;  %p2091_p2 = scmp.lt.u32.totalorder %s2089_s23, %s2084_s17 }
  0x63   : > { %p2087_p12 = pnand %p2086_p9, %p2085_p7  ;;  %p2093_p8 = scmp.lt.u32.totalorder %s2084_s17, %s2435_s10 }
  0x64   : > { %p2092_p4 = por %p2091_p2, %p2090_p1 }
  0x65   : > { %p2088_p0 = pneg %p2087_p12 }
  0x66   : > { %p2094_p13 = por %p2093_p8, %p2092_p4 }
  0x68   : > { %p2095_p6 = pnand %p2094_p13, %p2088_p0 }
  0x6a   : > { %2098 = shalt.err (!%p2095_p6)
}
  0x6b   : > { %s2099_s20 = scalar_lea.vmem %s2441_s14, 4096  ;;  %s2227_s21 = smov [#allocation2]  }
  0x6c   : > { %p2100_p10 = scmp.ne.s32.totalorder %s2441_s14, %s2099_s20  ;;  %s2104_s16 = sshll.u32 %s2227_s21, 4  ;;  %s2105_s16 = int_to_ptr.vmem [resolvable:$false] %s2104_s16 }
  0x6d   : > { %s2106_s29 = scalar_lea.vmem %s2105_s16, 8192  ;;  %p2107_p12 = scmp.lt.s32.totalorder %s2441_s14, %s2105_s16 }
  0x6e   : > { %p2102_p3 = pnand %p2100_p10, %p2086_p9  ;;  %p2108_p1 = scmp.lt.s32.totalorder %s2106_s29, %s2099_s20 }
  0x70   : > { %p2103_p7 = pneg %p2102_p3  ;;  %p2109_p2 = por %p2108_p1, %p2107_p12 }
  0x72   : > { %p2110_p4 = pnand %p2109_p2, %p2103_p7 }
  0x74   : > { %2113 = shalt.err (!%p2110_p4)
}
  0x75   : > { %1945 = dma.hbm_to_vmem [thread:$0]  (!%p2437_p11), %s2435_s10, 4096, %s2441_s14, %s2443_s12, %s2225_s13, %s2225_s13, %s2226_s15  }
  0x76   : > { %p2815_p9 = scmp.ne.s32.totalorder %s2809_s9, 0 }
  0x77   : > { %s2477_s17 = sand.u32 (!%p2815_p9), 1, %s2212_s25   ;;  %p2816_p0 = scmp.ne.s32.totalorder (!%p2815_p9), %s2806_s30, 0 }
  0x78   : > { %298 = sbr.rel (%p2815_p9) target bundleno = 891 (0x37b), region = 44  ;;  %s2480_s23 = sshll.u32 (!%p2815_p9), %s2477_s17, 8 }
  0x79   : > { %s301_s8 = scalar_lea.sflag (!%p2815_p9), [#allocation3], %s2477_s17  ;;  %s2484_s11 = scalar_lea.vmem (!%p2815_p9), [#allocation2], %s2480_s23 }
  0x7f   : > { %2187 = dma.done.wait (%p2816_p0), %s301_s8, 4096  }
  0x80   : > { %2189 = vsyncadd (%p2816_p0), %s301_s8, 4294963200  ;;  %p2817_p11 = scmp.eq.s32.totalorder %s2293_s28, 0 }
  0x82   : > { %2191 = dma.done.wait (%p2817_p11), [#allocation6], 4096   ;;  %p2818_p8 = pmov %p2817_p11 }
  0x84   : > { %2193 = vsyncadd (%p2818_p8), [#allocation6], 4294963200  ;;  %p2819_p13 = pmov %p2818_p8 }
  0x85   : > { %p2820_p6 = pmov %p2818_p8 }
  0x86   : > { %2195 = dma.done.wait (%p2819_p13), [#allocation9], 2048  }
  0x87   : > { %2197 = vsyncadd (%p2820_p6), [#allocation9], 4294965248  ;;  %v387_v0 = vld [vmem:[#allocation5] sm:$0xff]  ;;  %v388_v1 = vld [vmem:[#allocation5 + $0x8] sm:$0xff]  ;;  %s2602_s10 = scalar_lea.vmem [#allocation11], %s2480_s23  ;;  %s1416_s14 = sshll.u32 %s2293_s28, 12 }
  0x88   : > { %v389_v2 = vld [vmem:[#allocation5 + $0x10] sm:$0xff]  ;;  %v1802_v3 = vpack.c.bf16 %v388_v1, %v387_v0  ;;  %v390_v4 = vld [vmem:[#allocation5 + $0x18] sm:$0xff]  ;;  %v391_v6 = vld [vmem:[#allocation5 + $0x20] sm:$0xff]  ;;  %s2672_s21 = scalar_lea.hbm %s2801_s7, %s1416_s14  ;;  %s1255_s16 = sshll.u32 %s2602_s10, 4  ;;  %s2675_s16 = int_to_ptr.vmem [resolvable:$true] %s1255_s16 }
  0x89   : > { %v1806_v5 = vpack.c.bf16 %v390_v4, %v389_v2  ;;  %v392_v7 = vld [vmem:[#allocation5 + $0x28] sm:$0xff]  ;;  %v355_v9 = vld [vmem:[%s2484_s11] sm:$0xff]  ;;  %v393_v10 = vld [vmem:[#allocation5 + $0x30] sm:$0xff]  ;;  %s1226_s29 = scalar_lea.sflag [#allocation12], %s2477_s17  ;;  %s2114_s8 = scalar_lea.vmem %s2675_s16, 4096 }
  0x8a   : > { %1803 = vmatprep.subr.bf16.mxu0 %v1802_v3  ;;  %1898 = vmatprep.subr.bf16.mxu1 %v1802_v3  ;;  %v1810_v8 = vpack.c.bf16 %v392_v7, %v391_v6  ;;  %v394_v11 = vld [vmem:[#allocation5 + $0x38] sm:$0xff]  ;;  %v395_v13 = vld [vmem:[#allocation5 + $0x40] sm:$0xff]  ;;  %v396_v14 = vld [vmem:[#allocation5 + $0x48] sm:$0xff]  ;;  %p2115_p10 = scmp.ne.s32.totalorder %s2675_s16, %s2114_s8 }
  0x8b   : > { %1805 = vmatpush3.bf16.msra.mxu0 %v1802_v3  ;;  %1906 = vmatpush3.bf16.msra.mxu1 %v1802_v3  ;;  %v1814_v12 = vpack.c.bf16 %v394_v11, %v393_v10  ;;  %v371_v15 = vld [vmem:[%s2484_s11 + $0x80] sm:$0xff]  ;;  %v1818_v16 = vpack.c.bf16 %v396_v14, %v395_v13  ;;  %v397_v17 = vld [vmem:[#allocation5 + $0x50] sm:$0xff]  ;;  %v398_v18 = vld [vmem:[#allocation5 + $0x58] sm:$0xff] }
  0x8c   : > { %1807 = vmatprep.subr.bf16.mxu0 %v1806_v5  ;;  %1899 = vmatprep.subr.bf16.mxu1 %v1806_v5  ;;  %v1822_v19 = vpack.c.bf16 %v398_v18, %v397_v17  ;;  %v399_v20 = vld [vmem:[#allocation5 + $0x60] sm:$0xff]  ;;  %v400_v21 = vld [vmem:[#allocation5 + $0x68] sm:$0xff]  ;;  %v401_v23 = vld [vmem:[#allocation5 + $0x70] sm:$0xff]  ;;  %p2116_p3 = pnand %p2115_p10, %p2426_p5 }
  0x8d   : > { %1594 = vmatprep.mubr.f32.mxu0 %v355_v9  ;;  %1618 = vmatprep.mubr.f32.mxu1 %v371_v15  ;;  %v1826_v22 = vpack.c.bf16 %v400_v21, %v399_v20  ;;  %v402_v24 = vld [vmem:[#allocation5 + $0x78] sm:$0xff]  ;;  %v667_v26 = vld [vmem:[#allocation7] sm:$0xff]  ;;  %v668_v27 = vld [vmem:[#allocation7 + $0x8] sm:$0xff] }
  0x8e   : > { %v1830_v25 = vpack.c.bf16 %v402_v24, %v401_v23  ;;  %v1834_v28 = vpack.c.bf16 %v668_v27, %v667_v26  ;;  %v669_v29 = vld [vmem:[#allocation7 + $0x10] sm:$0xff]  ;;  %v670_v30 = vld [vmem:[#allocation7 + $0x18] sm:$0xff]  ;;  %v356_v31 = vld [vmem:[%s2484_s11 + $0x8] sm:$0xff]  ;;  %p2117_p7 = pneg %p2116_p3 }
  0x8f   : > { %1809 = vmatpush3.bf16.msra.mxu0 %v1806_v5  ;;  %1907 = vmatpush3.bf16.msra.mxu1 %v1806_v5  ;;  %v372_v32 = vld [vmem:[%s2484_s11 + $0x88] sm:$0xff]  ;;  %v357_v33 = vld [vmem:[%s2484_s11 + $0x10] sm:$0xff]  ;;  %v1838_v35 = vpack.c.bf16 %v670_v30, %v669_v29  ;;  %v671_v36 = vld [vmem:[#allocation7 + $0x20] sm:$0xff] }
  0x90   : > { %1811 = vmatprep.subr.bf16.mxu0 %v1810_v8  ;;  %1900 = vmatprep.subr.bf16.mxu1 %v1810_v8  ;;  %v373_v34 = vld [vmem:[%s2484_s11 + $0x90] sm:$0xff]  ;;  %v672_v37 = vld [vmem:[#allocation7 + $0x28] sm:$0xff]  ;;  %v358_v38 = vld [vmem:[%s2484_s11 + $0x18] sm:$0xff] }
  0x91   : > { %v374_v39 = vld [vmem:[%s2484_s11 + $0x98] sm:$0xff]  ;;  %v359_v40 = vld [vmem:[%s2484_s11 + $0x20] sm:$0xff]  ;;  %v1842_v42 = vpack.c.bf16 %v672_v37, %v671_v36  ;;  %v673_v43 = vld [vmem:[#allocation7 + $0x30] sm:$0xff] }
  0x92   : > { %v375_v41 = vld [vmem:[%s2484_s11 + $0xa0] sm:$0xff]  ;;  %v674_v44 = vld [vmem:[#allocation7 + $0x38] sm:$0xff]  ;;  %v360_v45 = vld [vmem:[%s2484_s11 + $0x28] sm:$0xff] }
  0x93   : > { %1813 = vmatpush3.bf16.msra.mxu0 %v1810_v8  ;;  %1908 = vmatpush3.bf16.msra.mxu1 %v1810_v8  ;;  %v376_v46 = vld [vmem:[%s2484_s11 + $0xa8] sm:$0xff]  ;;  %v361_v47 = vld [vmem:[%s2484_s11 + $0x30] sm:$0xff]  ;;  %v1846_v49 = vpack.c.bf16 %v674_v44, %v673_v43  ;;  %v675_v50 = vld [vmem:[#allocation7 + $0x40] sm:$0xff] }
  0x94   : > { %1815 = vmatprep.subr.bf16.mxu0 %v1814_v12  ;;  %1901 = vmatprep.subr.bf16.mxu1 %v1814_v12  ;;  %v377_v48 = vld [vmem:[%s2484_s11 + $0xb0] sm:$0xff]  ;;  %v676_v51 = vld [vmem:[#allocation7 + $0x48] sm:$0xff]  ;;  %v362_v52 = vld [vmem:[%s2484_s11 + $0x38] sm:$0xff] }
  0x95   : > { %v378_v53 = vld [vmem:[%s2484_s11 + $0xb8] sm:$0xff]  ;;  %v363_v54 = vld [vmem:[%s2484_s11 + $0x40] sm:$0xff]  ;;  %v1850_v56 = vpack.c.bf16 %v676_v51, %v675_v50  ;;  %v677_v57 = vld [vmem:[#allocation7 + $0x50] sm:$0xff] }
  0x96   : > { %v379_v55 = vld [vmem:[%s2484_s11 + $0xc0] sm:$0xff]  ;;  %v678_v58 = vld [vmem:[#allocation7 + $0x58] sm:$0xff]  ;;  %v364_v59 = vld [vmem:[%s2484_s11 + $0x48] sm:$0xff] }
  0x97   : > { %1817 = vmatpush3.bf16.msra.mxu0 %v1814_v12  ;;  %1909 = vmatpush3.bf16.msra.mxu1 %v1814_v12  ;;  %v380_v60 = vld [vmem:[%s2484_s11 + $0xc8] sm:$0xff]  ;;  %v365_v61 = vld [vmem:[%s2484_s11 + $0x50] sm:$0xff]  ;;  %v1854_v63 = vpack.c.bf16 %v678_v58, %v677_v57  ;;  %v679_v0 = vld [vmem:[#allocation7 + $0x60] sm:$0xff] }
  0x98   : > { %1819 = vmatprep.subr.bf16.mxu0 %v1818_v16  ;;  %1902 = vmatprep.subr.bf16.mxu1 %v1818_v16  ;;  %v381_v62 = vld [vmem:[%s2484_s11 + $0xd0] sm:$0xff]  ;;  %v680_v1 = vld [vmem:[#allocation7 + $0x68] sm:$0xff]  ;;  %v366_v2 = vld [vmem:[%s2484_s11 + $0x58] sm:$0xff] }
  0x99   : > { %v382_v3 = vld [vmem:[%s2484_s11 + $0xd8] sm:$0xff]  ;;  %v367_v4 = vld [vmem:[%s2484_s11 + $0x60] sm:$0xff]  ;;  %v1858_v6 = vpack.c.bf16 %v680_v1, %v679_v0  ;;  %v368_v7 = vld [vmem:[%s2484_s11 + $0x68] sm:$0xff] }
  0x9a   : > { %v383_v5 = vld [vmem:[%s2484_s11 + $0xe0] sm:$0xff]  ;;  %v384_v8 = vld [vmem:[%s2484_s11 + $0xe8] sm:$0xff]  ;;  %v369_v9 = vld [vmem:[%s2484_s11 + $0x70] sm:$0xff] }
  0x9b   : > { %1821 = vmatpush3.bf16.msra.mxu0 %v1818_v16  ;;  %1910 = vmatpush3.bf16.msra.mxu1 %v1818_v16  ;;  %v385_v10 = vld [vmem:[%s2484_s11 + $0xf0] sm:$0xff]  ;;  %v370_v11 = vld [vmem:[%s2484_s11 + $0x78] sm:$0xff]  ;;  %v947_v16 = vld [vmem:[#allocation8] sm:$0xff] }
  0x9c   : > { %1823 = vmatprep.subr.bf16.mxu0 %v1822_v19  ;;  %1903 = vmatprep.subr.bf16.mxu1 %v1822_v19  ;;  %v386_v12 = vld [vmem:[%s2484_s11 + $0xf8] sm:$0xff]  ;;  %v681_v13 = vld [vmem:[#allocation7 + $0x70] sm:$0xff]  ;;  %v948_v17 = vld [vmem:[#allocation8 + $0x8] sm:$0xff]  ;;  %s2228_s11 = smov [#allocation11]  }
  0x9d   : > { %v682_v14 = vld [vmem:[#allocation7 + $0x78] sm:$0xff]  ;;  %v949_v18 = vld [vmem:[#allocation8 + $0x10] sm:$0xff]  ;;  %v952_v23 = vld [vmem:[#allocation8 + $0x28] sm:$0xff]  ;;  %s2118_s30 = sshll.u32 %s2228_s11, 4  ;;  %s2119_s30 = int_to_ptr.vmem [resolvable:$false] %s2118_s30 }
  0x9e   : > { %v1862_v15 = vpack.c.bf16 %v682_v14, %v681_v13  ;;  %v950_v20 = vld [vmem:[#allocation8 + $0x18] sm:$0xff]  ;;  %v956_v29 = vld [vmem:[#allocation8 + $0x48] sm:$0xff]  ;;  %v2533_v37 = vld [vmem:[%s2796_s2] ss:$0 sm:$0xff]  ;;  %s2120_s9 = scalar_lea.vmem %s2119_s30, 8192  ;;  %p2121_p12 = scmp.lt.s32.totalorder %s2675_s16, %s2119_s30 }
  0x9f   : > { %1825 = vmatpush3.bf16.msra.mxu0 %v1822_v19  ;;  %1911 = vmatpush3.bf16.msra.mxu1 %v1822_v19  ;;  %v1866_v19 = vpack.c.bf16 %v948_v17, %v947_v16  ;;  %v1870_v21 = vpack.c.bf16 %v950_v20, %v949_v18  ;;  %v954_v26 = vld [vmem:[#allocation8 + $0x38] sm:$0xff]  ;;  %p2122_p1 = scmp.lt.s32.totalorder %s2120_s9, %s2114_s8 }
  0xa0   : > { %1827 = vmatprep.subr.bf16.mxu0 %v1826_v22  ;;  %1904 = vmatprep.subr.bf16.mxu1 %v1826_v22 }
  0xa1   : > { %p2123_p2 = por %p2122_p1, %p2121_p12 }
  0xa3   : > { %1829 = vmatpush3.bf16.msra.mxu0 %v1826_v22  ;;  %1912 = vmatpush3.bf16.msra.mxu1 %v1826_v22  ;;  %v951_v22 = vld [vmem:[#allocation8 + $0x20] sm:$0xff]  ;;  %p2124_p4 = pnand %p2123_p2, %p2117_p7 }
  0xa4   : > { %1831 = vmatprep.subr.bf16.mxu0 %v1830_v25  ;;  %1905 = vmatprep.subr.bf16.mxu1 %v1830_v25  ;;  %v1874_v24 = vpack.c.bf16 %v952_v23, %v951_v22 }
  0xa7   : > { %1833 = vmatpush3.bf16.msra.mxu0 %v1830_v25  ;;  %1913 = vmatpush3.bf16.msra.mxu1 %v1830_v25  ;;  %v953_v25 = vld [vmem:[#allocation8 + $0x30] sm:$0xff] }
  0xa8   : > { %1835 = vmatprep.subr.bf16.mxu1 %v1834_v28  ;;  %1867 = vmatprep.subr.bf16.mxu0 %v1866_v19  ;;  %v1878_v27 = vpack.c.bf16 %v954_v26, %v953_v25 }
  0xaa   : > { %1595 = vmatmul.mubr.f32.vlgmr.msra.gmra.mrb[0].mxu0 %v356_v31  ;;  %1619 = vmatmul.mubr.f32.vlgmr.msra.gmra.mrb[0].mxu1 %v372_v32  ;;  %v957_v31 = vld [vmem:[#allocation8 + $0x50] sm:$0xff]  ;;  %v958_v32 = vld [vmem:[#allocation8 + $0x58] sm:$0xff] }
  0xab   : > { %1597 = vmatprep.mubr.f32.mxu0 %v357_v33  ;;  %1621 = vmatprep.mubr.f32.mxu1 %v373_v34  ;;  %v1886_v33 = vpack.c.bf16 %v958_v32, %v957_v31  ;;  %v959_v34 = vld [vmem:[#allocation8 + $0x60] sm:$0xff] }
  0xac   : > { %1837 = vmatpush3.bf16.msra.mxu1 %v1834_v28  ;;  %1869 = vmatpush3.bf16.msra.mxu0 %v1866_v19  ;;  %v955_v28 = vld [vmem:[#allocation8 + $0x40] sm:$0xff] }
  0xad   : > { %1839 = vmatprep.subr.bf16.mxu1 %v1838_v35  ;;  %1871 = vmatprep.subr.bf16.mxu0 %v1870_v21  ;;  %v1882_v30 = vpack.c.bf16 %v956_v29, %v955_v28 }
  0xae   : > { %1598 = vmatmul.mubr.f32.gmra.mrb[2].mxu0 %v358_v38  ;;  %1622 = vmatmul.mubr.f32.gmra.mrb[2].mxu1 %v374_v39 }
  0xaf   : > { %1600 = vmatprep.mubr.f32.mxu0 %v359_v40  ;;  %1624 = vmatprep.mubr.f32.mxu1 %v375_v41 }
  0xb0   : > { %1841 = vmatpush3.bf16.msra.mxu1 %v1838_v35  ;;  %1873 = vmatpush3.bf16.msra.mxu0 %v1870_v21  ;;  %v960_v35 = vld [vmem:[#allocation8 + $0x68] sm:$0xff] }
  0xb1   : > { %1843 = vmatprep.subr.bf16.mxu1 %v1842_v42  ;;  %1875 = vmatprep.subr.bf16.mxu0 %v1874_v24  ;;  %v1890_v36 = vpack.c.bf16 %v960_v35, %v959_v34 }
  0xb2   : > { %1601 = vmatmul.mubr.f32.gmra.mrb[4].mxu0 %v360_v45  ;;  %1625 = vmatmul.mubr.f32.gmra.mrb[4].mxu1 %v376_v46 }
  0xb3   : > { %1603 = vmatprep.mubr.f32.mxu0 %v361_v47  ;;  %1627 = vmatprep.mubr.f32.mxu1 %v377_v48 }
  0xb4   : > { %1845 = vmatpush3.bf16.msra.mxu1 %v1842_v42  ;;  %1877 = vmatpush3.bf16.msra.mxu0 %v1874_v24 }
  0xb5   : > { %1847 = vmatprep.subr.bf16.mxu1 %v1846_v49  ;;  %1879 = vmatprep.subr.bf16.mxu0 %v1878_v27 }
  0xb6   : > { %1604 = vmatmul.mubr.f32.gmra.mrb[6].mxu0 %v362_v52  ;;  %1628 = vmatmul.mubr.f32.gmra.mrb[6].mxu1 %v378_v53 }
  0xb7   : > { %1606 = vmatprep.mubr.f32.mxu0 %v363_v54  ;;  %1630 = vmatprep.mubr.f32.mxu1 %v379_v55 }
  0xb8   : > { %1849 = vmatpush3.bf16.msra.mxu1 %v1846_v49  ;;  %1881 = vmatpush3.bf16.msra.mxu0 %v1878_v27 }
  0xb9   : > { %1851 = vmatprep.subr.bf16.mxu1 %v1850_v56  ;;  %1883 = vmatprep.subr.bf16.mxu0 %v1882_v30 }
  0xba   : > { %1607 = vmatmul.mubr.f32.gmra.mrb[8].mxu0 %v364_v59  ;;  %1631 = vmatmul.mubr.f32.gmra.mrb[8].mxu1 %v380_v60 }
  0xbb   : > { %1609 = vmatprep.mubr.f32.mxu0 %v365_v61  ;;  %1633 = vmatprep.mubr.f32.mxu1 %v381_v62 }
  0xbc   : > { %1853 = vmatpush3.bf16.msra.mxu1 %v1850_v56  ;;  %1885 = vmatpush3.bf16.msra.mxu0 %v1882_v30 }
  0xbd   : > { %1855 = vmatprep.subr.bf16.mxu1 %v1854_v63  ;;  %1887 = vmatprep.subr.bf16.mxu0 %v1886_v33 }
  0xbe   : > { %1610 = vmatmul.mubr.f32.gmra.mrb[10].mxu0 %v366_v2  ;;  %1634 = vmatmul.mubr.f32.gmra.mrb[10].mxu1 %v382_v3 }
  0xbf   : > { %1612 = vmatprep.mubr.f32.mxu0 %v367_v4  ;;  %1636 = vmatprep.mubr.f32.mxu1 %v383_v5 }
  0xc0   : > { %1857 = vmatpush3.bf16.msra.mxu1 %v1854_v63  ;;  %1889 = vmatpush3.bf16.msra.mxu0 %v1886_v33 }
  0xc1   : > { %1859 = vmatprep.subr.bf16.mxu1 %v1858_v6  ;;  %1891 = vmatprep.subr.bf16.mxu0 %v1890_v36 }
  0xc2   : > { %1613 = vmatmul.mubr.f32.gmra.mrb[12].mxu0 %v368_v7  ;;  %1637 = vmatmul.mubr.f32.gmra.mrb[12].mxu1 %v384_v8 }
  0xc3   : > { %1615 = vmatprep.mubr.f32.mxu0 %v369_v9  ;;  %1639 = vmatprep.mubr.f32.mxu1 %v385_v10 }
  0xc4   : > { %1861 = vmatpush3.bf16.msra.mxu1 %v1858_v6  ;;  %1893 = vmatpush3.bf16.msra.mxu0 %v1890_v36 }
  0xc5   : > { %1863 = vmatprep.subr.bf16.mxu1 %v1862_v15 }
  0xc6   : > { %1616 = vmatmul.mubr.f32.gmra.mrb[14].mxu0 %v370_v11  ;;  %1640 = vmatmul.mubr.f32.gmra.mrb[14].mxu1 %v386_v12 }
  0xc8   : > { %1865 = vmatpush3.bf16.msra.mxu1 %v1862_v15 }
 0x17d   : > { %v1596_v38 = vpop.f32.mrb[0].mxu0  ;;  %v2535_v39 = vpop.f32.mrb[0].mxu1 }
 0x17e   : > { %v482_v40 = vadd.f32 %v1596_v38, %v2533_v37  ;;  %v476_v41 = vpop.f32.mrb[1].mxu0  ;;  %v2538_v42 = vpop.f32.mrb[1].mxu1 }
 0x17f   : > { %v477_v43 = vadd.f32 %v2533_v37, %v476_v41  ;;  %v557_v30 = vadd.f32 %v2533_v37, %v2538_v42 }
 0x180   : > { %v636_v47 = vmax.f32 %v482_v40, 0.0 }
 0x181   : > { %v635_v44 = vmax.f32 %v477_v43, 0.0  ;;  %v1599_v45 = vpop.f32.mrb[2].mxu0  ;;  %v2541_v46 = vpop.f32.mrb[2].mxu1  ;;  %v651_v40 = vmax.f32 %v557_v30, 0.0 }
 0x182   : > { %v492_v48 = vadd.f32 %v1599_v45, %v2533_v37  ;;  %v486_v49 = vpop.f32.mrb[3].mxu0  ;;  %v2544_v50 = vpop.f32.mrb[3].mxu1 }
 0x183   : > { %v487_v51 = vadd.f32 %v2533_v37, %v486_v49  ;;  %1674 = vmatprep.mubr.f32.mxu1 %v635_v44  ;;  %v567_v41 = vadd.f32 %v2533_v37, %v2544_v50  ;;  %v562_v44 = vadd.f32 %v2535_v39, %v2533_v37 }
 0x184   : > { %1675 = vmatmul.mubr.f32.vlgmr.msra.gmra.mrb[16].mxu1 %v636_v47  ;;  %v638_v55 = vmax.f32 %v492_v48, 0.0  ;;  %v572_v48 = vadd.f32 %v2541_v46, %v2533_v37 }
 0x185   : > { %v637_v52 = vmax.f32 %v487_v51, 0.0  ;;  %v1602_v53 = vpop.f32.mrb[4].mxu0  ;;  %v2547_v54 = vpop.f32.mrb[4].mxu1  ;;  %v653_v42 = vmax.f32 %v567_v41, 0.0  ;;  %v652_v47 = vmax.f32 %v562_v44, 0.0 }
 0x186   : > { %v502_v56 = vadd.f32 %v1602_v53, %v2533_v37  ;;  %v496_v57 = vpop.f32.mrb[5].mxu0  ;;  %v2550_v58 = vpop.f32.mrb[5].mxu1  ;;  %v654_v51 = vmax.f32 %v572_v48, 0.0  ;;  %v582_v39 = vadd.f32 %v2547_v54, %v2533_v37 }
 0x187   : > { %v497_v59 = vadd.f32 %v2533_v37, %v496_v57  ;;  %1677 = vmatprep.mubr.f32.mxu1 %v637_v52  ;;  %v577_v45 = vadd.f32 %v2533_v37, %v2550_v58 }
 0x188   : > { %1678 = vmatmul.mubr.f32.gmra.mrb[18].mxu1 %v638_v55  ;;  %v640_v63 = vmax.f32 %v502_v56, 0.0  ;;  %v656_v55 = vmax.f32 %v582_v39, 0.0 }
 0x189   : > { %v639_v60 = vmax.f32 %v497_v59, 0.0  ;;  %v1605_v61 = vpop.f32.mrb[6].mxu0  ;;  %v2553_v62 = vpop.f32.mrb[6].mxu1  ;;  %v655_v49 = vmax.f32 %v577_v45, 0.0 }
 0x18a   : > { %v512_v0 = vadd.f32 %v1605_v61, %v2533_v37  ;;  %v506_v1 = vpop.f32.mrb[7].mxu0  ;;  %v586_v2 = vpop.f32.mrb[7].mxu1  ;;  %v592_v56 = vadd.f32 %v2553_v62, %v2533_v37 }
 0x18b   : > { %v507_v3 = vadd.f32 %v2533_v37, %v506_v1  ;;  %1680 = vmatprep.mubr.f32.mxu1 %v639_v60  ;;  %v587_v50 = vadd.f32 %v2533_v37, %v586_v2 }
 0x18c   : > { %1681 = vmatmul.mubr.f32.gmra.mrb[20].mxu1 %v640_v63  ;;  %v642_v7 = vmax.f32 %v512_v0, 0.0  ;;  %v658_v58 = vmax.f32 %v592_v56, 0.0 }
 0x18d   : > { %v641_v4 = vmax.f32 %v507_v3, 0.0  ;;  %v1608_v5 = vpop.f32.mrb[8].mxu0  ;;  %v2557_v6 = vpop.f32.mrb[8].mxu1  ;;  %v657_v52 = vmax.f32 %v587_v50, 0.0 }
 0x18e   : > { %v522_v8 = vadd.f32 %v1608_v5, %v2533_v37  ;;  %v516_v9 = vpop.f32.mrb[9].mxu0  ;;  %v596_v10 = vpop.f32.mrb[9].mxu1  ;;  %v602_v59 = vadd.f32 %v2557_v6, %v2533_v37 }
 0x18f   : > { %v517_v11 = vadd.f32 %v2533_v37, %v516_v9  ;;  %1683 = vmatprep.mubr.f32.mxu1 %v641_v4  ;;  %v597_v53 = vadd.f32 %v2533_v37, %v596_v10  ;;  %v2597_v10 = vld [vmem:[%s2798_s4] ss:$0 sm:$0xff] }
 0x190   : > { %1684 = vmatmul.mubr.f32.gmra.mrb[22].mxu1 %v642_v7  ;;  %v644_v15 = vmax.f32 %v522_v8, 0.0  ;;  %v660_v61 = vmax.f32 %v602_v59, 0.0  ;;  %v961_v7 = vld [vmem:[#allocation8 + $0x70] sm:$0xff]  ;;  %v962_v8 = vld [vmem:[#allocation8 + $0x78] sm:$0xff] }
 0x191   : > { %v643_v12 = vmax.f32 %v517_v11, 0.0  ;;  %v1611_v13 = vpop.f32.mrb[10].mxu0  ;;  %v2561_v14 = vpop.f32.mrb[10].mxu1  ;;  %v659_v46 = vmax.f32 %v597_v53, 0.0  ;;  %v1894_v9 = vpack.c.bf16 %v962_v8, %v961_v7 }
 0x192   : > { %v532_v16 = vadd.f32 %v1611_v13, %v2533_v37  ;;  %v526_v17 = vpop.f32.mrb[11].mxu0  ;;  %v606_v18 = vpop.f32.mrb[11].mxu1  ;;  %v612_v63 = vadd.f32 %v2561_v14, %v2533_v37 }
 0x193   : > { %v527_v19 = vadd.f32 %v2533_v37, %v526_v17  ;;  %1686 = vmatprep.mubr.f32.mxu1 %v643_v12  ;;  %v607_v57 = vadd.f32 %v2533_v37, %v606_v18  ;;  %1895 = vmatprep.subr.bf16.mxu0 %v1894_v9 }
 0x194   : > { %1687 = vmatmul.mubr.f32.gmra.mrb[24].mxu1 %v644_v15  ;;  %v646_v23 = vmax.f32 %v532_v16, 0.0  ;;  %v662_v1 = vmax.f32 %v612_v63, 0.0  ;;  %1897 = vmatpush3.bf16.msra.mxu0 %v1894_v9 }
 0x195   : > { %v645_v20 = vmax.f32 %v527_v19, 0.0  ;;  %v1614_v21 = vpop.f32.mrb[12].mxu0  ;;  %v1638_v22 = vpop.f32.mrb[12].mxu1  ;;  %v661_v54 = vmax.f32 %v607_v57, 0.0 }
 0x196   : > { %v542_v24 = vadd.f32 %v1614_v21, %v2533_v37  ;;  %v536_v25 = vpop.f32.mrb[13].mxu0  ;;  %v616_v26 = vpop.f32.mrb[13].mxu1  ;;  %v622_v2 = vadd.f32 %v1638_v22, %v2533_v37 }
 0x197   : > { %v537_v27 = vadd.f32 %v2533_v37, %v536_v25  ;;  %1689 = vmatprep.mubr.f32.mxu1 %v645_v20  ;;  %v617_v60 = vadd.f32 %v2533_v37, %v616_v26 }
 0x198   : > { %1690 = vmatmul.mubr.f32.gmra.mrb[26].mxu1 %v646_v23  ;;  %v648_v32 = vmax.f32 %v542_v24, 0.0  ;;  %v664_v4 = vmax.f32 %v622_v2, 0.0 }
 0x199   : > { %v647_v28 = vmax.f32 %v537_v27, 0.0  ;;  %v1617_v29 = vpop.f32.mrb[14].mxu0  ;;  %v1641_v31 = vpop.f32.mrb[14].mxu1  ;;  %v663_v62 = vmax.f32 %v617_v60, 0.0 }
 0x19a   : > { %v552_v33 = vadd.f32 %v1617_v29, %v2533_v37  ;;  %v546_v34 = vpop.f32.mrb[15].mxu0  ;;  %v626_v35 = vpop.f32.mrb[15].mxu1  ;;  %v632_v5 = vadd.f32 %v1641_v31, %v2533_v37 }
 0x19b   : > { %v547_v36 = vadd.f32 %v2533_v37, %v546_v34  ;;  %1692 = vmatprep.mubr.f32.mxu1 %v647_v28  ;;  %v627_v0 = vadd.f32 %v2533_v37, %v626_v35 }
 0x19c   : > { %1693 = vmatmul.mubr.f32.gmra.mrb[28].mxu1 %v648_v32  ;;  %v650_v43 = vmax.f32 %v552_v33, 0.0  ;;  %v666_v6 = vmax.f32 %v632_v5, 0.0 }
 0x19d   : > { %v649_v38 = vmax.f32 %v547_v36, 0.0  ;;  %v665_v3 = vmax.f32 %v627_v0, 0.0 }
 0x19f   : > { %1695 = vmatprep.mubr.f32.mxu1 %v649_v38 }
 0x1a0   : > { %1696 = vmatmul.mubr.f32.gmra.mrb[30].mxu1 %v650_v43 }
 0x1a1   : > { %1698 = vmatprep.mubr.f32.mxu1 %v651_v40 }
 0x1a4   : > { %1699 = vmatmul.mubr.f32.gmra.mrb[32].mxu1 %v652_v47 }
 0x1a5   : > { %1701 = vmatprep.mubr.f32.mxu1 %v653_v42 }
 0x1a8   : > { %1702 = vmatmul.mubr.f32.gmra.mrb[34].mxu1 %v654_v51 }
 0x1a9   : > { %1704 = vmatprep.mubr.f32.mxu1 %v655_v49 }
 0x1ac   : > { %1705 = vmatmul.mubr.f32.gmra.mrb[36].mxu1 %v656_v55 }
 0x1ad   : > { %1707 = vmatprep.mubr.f32.mxu1 %v657_v52 }
 0x1b0   : > { %1708 = vmatmul.mubr.f32.gmra.mrb[38].mxu1 %v658_v58 }
 0x1b1   : > { %1710 = vmatprep.mubr.f32.mxu1 %v659_v46 }
 0x1b4   : > { %1711 = vmatmul.mubr.f32.gmra.mrb[40].mxu1 %v660_v61 }
 0x1b5   : > { %1713 = vmatprep.mubr.f32.mxu1 %v661_v54 }
 0x1b8   : > { %1714 = vmatmul.mubr.f32.gmra.mrb[42].mxu1 %v662_v1 }
 0x1b9   : > { %1716 = vmatprep.mubr.f32.mxu1 %v663_v62 }
 0x1bc   : > { %1717 = vmatmul.mubr.f32.gmra.mrb[44].mxu1 %v664_v4 }
 0x1bd   : > { %1719 = vmatprep.mubr.f32.mxu1 %v665_v3 }
 0x1c0   : > { %1720 = vmatmul.mubr.f32.gmra.mrb[46].mxu1 %v666_v6 }
 0x257   : > { %v1676_v11 = vpop.f32.mrb[16].mxu1 }
 0x258   : > { %v762_v12 = vadd.f32 %v1676_v11, %v2597_v10  ;;  %v756_v13 = vpop.f32.mrb[17].mxu1 }
 0x259   : > { %v757_v37 = vadd.f32 %v2597_v10, %v756_v13 }
 0x25a   : > { %916 = vst [vmem:[%s2602_s10 + $0x8] sm:$0xff] %v762_v12 }
 0x25b   : > { %915 = vst [vmem:[%s2602_s10] sm:$0xff] %v757_v37  ;;  %v1679_v14 = vpop.f32.mrb[18].mxu1  ;;  %1754 = vmatprep.mubr.f32.mxu0 %v757_v37 }
 0x25c   : > { %v772_v15 = vadd.f32 %v1679_v14, %v2597_v10  ;;  %v766_v16 = vpop.f32.mrb[19].mxu1  ;;  %1755 = vmatmul.mubr.f32.vlgmr.msra.gmra.mrb[16].mxu0 %v762_v12 }
 0x25d   : > { %v767_v17 = vadd.f32 %v2597_v10, %v766_v16 }
 0x25e   : > { %918 = vst [vmem:[%s2602_s10 + $0x18] sm:$0xff] %v772_v15 }
 0x25f   : > { %917 = vst [vmem:[%s2602_s10 + $0x10] sm:$0xff] %v767_v17  ;;  %v1682_v18 = vpop.f32.mrb[20].mxu1  ;;  %1757 = vmatprep.mubr.f32.mxu0 %v767_v17 }
 0x260   : > { %v782_v19 = vadd.f32 %v1682_v18, %v2597_v10  ;;  %v776_v20 = vpop.f32.mrb[21].mxu1  ;;  %1758 = vmatmul.mubr.f32.gmra.mrb[18].mxu0 %v772_v15 }
 0x261   : > { %v777_v21 = vadd.f32 %v2597_v10, %v776_v20 }
 0x262   : > { %920 = vst [vmem:[%s2602_s10 + $0x28] sm:$0xff] %v782_v19 }
 0x263   : > { %919 = vst [vmem:[%s2602_s10 + $0x20] sm:$0xff] %v777_v21  ;;  %v1685_v22 = vpop.f32.mrb[22].mxu1  ;;  %1760 = vmatprep.mubr.f32.mxu0 %v777_v21 }
 0x264   : > { %v792_v23 = vadd.f32 %v1685_v22, %v2597_v10  ;;  %v786_v24 = vpop.f32.mrb[23].mxu1  ;;  %1761 = vmatmul.mubr.f32.gmra.mrb[20].mxu0 %v782_v19 }
 0x265   : > { %v787_v25 = vadd.f32 %v2597_v10, %v786_v24 }
 0x266   : > { %922 = vst [vmem:[%s2602_s10 + $0x38] sm:$0xff] %v792_v23 }
 0x267   : > { %921 = vst [vmem:[%s2602_s10 + $0x30] sm:$0xff] %v787_v25  ;;  %v1688_v26 = vpop.f32.mrb[24].mxu1  ;;  %1763 = vmatprep.mubr.f32.mxu0 %v787_v25 }
 0x268   : > { %v802_v27 = vadd.f32 %v1688_v26, %v2597_v10  ;;  %v796_v28 = vpop.f32.mrb[25].mxu1  ;;  %1764 = vmatmul.mubr.f32.gmra.mrb[22].mxu0 %v792_v23 }
 0x269   : > { %v797_v29 = vadd.f32 %v2597_v10, %v796_v28 }
 0x26a   : > { %924 = vst [vmem:[%s2602_s10 + $0x48] sm:$0xff] %v802_v27 }
 0x26b   : > { %923 = vst [vmem:[%s2602_s10 + $0x40] sm:$0xff] %v797_v29  ;;  %v1691_v30 = vpop.f32.mrb[26].mxu1  ;;  %1766 = vmatprep.mubr.f32.mxu0 %v797_v29 }
 0x26c   : > { %v812_v31 = vadd.f32 %v1691_v30, %v2597_v10  ;;  %v806_v32 = vpop.f32.mrb[27].mxu1  ;;  %1767 = vmatmul.mubr.f32.gmra.mrb[24].mxu0 %v802_v27 }
 0x26d   : > { %v807_v33 = vadd.f32 %v2597_v10, %v806_v32 }
 0x26e   : > { %926 = vst [vmem:[%s2602_s10 + $0x58] sm:$0xff] %v812_v31 }
 0x26f   : > { %925 = vst [vmem:[%s2602_s10 + $0x50] sm:$0xff] %v807_v33  ;;  %v1694_v34 = vpop.f32.mrb[28].mxu1  ;;  %1769 = vmatprep.mubr.f32.mxu0 %v807_v33 }
 0x270   : > { %v822_v35 = vadd.f32 %v1694_v34, %v2597_v10  ;;  %v816_v36 = vpop.f32.mrb[29].mxu1  ;;  %1770 = vmatmul.mubr.f32.gmra.mrb[26].mxu0 %v812_v31 }
 0x271   : > { %v817_v38 = vadd.f32 %v2597_v10, %v816_v36 }
 0x272   : > { %928 = vst [vmem:[%s2602_s10 + $0x68] sm:$0xff] %v822_v35 }
 0x273   : > { %927 = vst [vmem:[%s2602_s10 + $0x60] sm:$0xff] %v817_v38  ;;  %v1697_v40 = vpop.f32.mrb[30].mxu1  ;;  %1772 = vmatprep.mubr.f32.mxu0 %v817_v38 }
 0x274   : > { %v832_v41 = vadd.f32 %v1697_v40, %v2597_v10  ;;  %v826_v43 = vpop.f32.mrb[31].mxu1  ;;  %1773 = vmatmul.mubr.f32.gmra.mrb[28].mxu0 %v822_v35 }
 0x275   : > { %v827_v44 = vadd.f32 %v2597_v10, %v826_v43 }
 0x276   : > { %930 = vst [vmem:[%s2602_s10 + $0x78] sm:$0xff] %v832_v41 }
 0x277   : > { %929 = vst [vmem:[%s2602_s10 + $0x70] sm:$0xff] %v827_v44  ;;  %v1700_v42 = vpop.f32.mrb[32].mxu1  ;;  %1775 = vmatprep.mubr.f32.mxu0 %v827_v44 }
 0x278   : > { %v842_v45 = vadd.f32 %v1700_v42, %v2597_v10  ;;  %v836_v47 = vpop.f32.mrb[33].mxu1  ;;  %1776 = vmatmul.mubr.f32.gmra.mrb[30].mxu0 %v832_v41 }
 0x279   : > { %v837_v48 = vadd.f32 %v2597_v10, %v836_v47 }
 0x27a   : > { %932 = vst [vmem:[%s2602_s10 + $0x88] sm:$0xff] %v842_v45 }
 0x27b   : > { %931 = vst [vmem:[%s2602_s10 + $0x80] sm:$0xff] %v837_v48  ;;  %v1703_v49 = vpop.f32.mrb[34].mxu1  ;;  %1778 = vmatprep.mubr.f32.mxu0 %v837_v48 }
 0x27c   : > { %v852_v50 = vadd.f32 %v1703_v49, %v2597_v10  ;;  %v846_v51 = vpop.f32.mrb[35].mxu1  ;;  %1779 = vmatmul.mubr.f32.gmra.mrb[32].mxu0 %v842_v45 }
 0x27d   : > { %v847_v39 = vadd.f32 %v2597_v10, %v846_v51 }
 0x27e   : > { %934 = vst [vmem:[%s2602_s10 + $0x98] sm:$0xff] %v852_v50 }
 0x27f   : > { %933 = vst [vmem:[%s2602_s10 + $0x90] sm:$0xff] %v847_v39  ;;  %v1706_v52 = vpop.f32.mrb[36].mxu1  ;;  %1781 = vmatprep.mubr.f32.mxu0 %v847_v39 }
 0x280   : > { %v862_v53 = vadd.f32 %v1706_v52, %v2597_v10  ;;  %v856_v55 = vpop.f32.mrb[37].mxu1  ;;  %1782 = vmatmul.mubr.f32.gmra.mrb[34].mxu0 %v852_v50 }
 0x281   : > { %v857_v56 = vadd.f32 %v2597_v10, %v856_v55 }
 0x282   : > { %936 = vst [vmem:[%s2602_s10 + $0xa8] sm:$0xff] %v862_v53 }
 0x283   : > { %935 = vst [vmem:[%s2602_s10 + $0xa0] sm:$0xff] %v857_v56  ;;  %v1709_v46 = vpop.f32.mrb[38].mxu1  ;;  %1784 = vmatprep.mubr.f32.mxu0 %v857_v56 }
 0x284   : > { %v872_v57 = vadd.f32 %v1709_v46, %v2597_v10  ;;  %v866_v58 = vpop.f32.mrb[39].mxu1  ;;  %1785 = vmatmul.mubr.f32.gmra.mrb[36].mxu0 %v862_v53 }
 0x285   : > { %v867_v59 = vadd.f32 %v2597_v10, %v866_v58 }
 0x286   : > { %938 = vst [vmem:[%s2602_s10 + $0xb8] sm:$0xff] %v872_v57 }
 0x287   : > { %937 = vst [vmem:[%s2602_s10 + $0xb0] sm:$0xff] %v867_v59  ;;  %v1712_v54 = vpop.f32.mrb[40].mxu1  ;;  %1787 = vmatprep.mubr.f32.mxu0 %v867_v59 }
 0x288   : > { %v882_v60 = vadd.f32 %v1712_v54, %v2597_v10  ;;  %v876_v61 = vpop.f32.mrb[41].mxu1  ;;  %1788 = vmatmul.mubr.f32.gmra.mrb[38].mxu0 %v872_v57 }
 0x289   : > { %v877_v63 = vadd.f32 %v2597_v10, %v876_v61 }
 0x28a   : > { %940 = vst [vmem:[%s2602_s10 + $0xc8] sm:$0xff] %v882_v60 }
 0x28b   : > { %939 = vst [vmem:[%s2602_s10 + $0xc0] sm:$0xff] %v877_v63  ;;  %v1715_v62 = vpop.f32.mrb[42].mxu1  ;;  %1790 = vmatprep.mubr.f32.mxu0 %v877_v63 }
 0x28c   : > { %v892_v0 = vadd.f32 %v1715_v62, %v2597_v10  ;;  %v886_v1 = vpop.f32.mrb[43].mxu1  ;;  %1791 = vmatmul.mubr.f32.gmra.mrb[40].mxu0 %v882_v60 }
 0x28d   : > { %v887_v2 = vadd.f32 %v2597_v10, %v886_v1 }
 0x28e   : > { %942 = vst [vmem:[%s2602_s10 + $0xd8] sm:$0xff] %v892_v0 }
 0x28f   : > { %941 = vst [vmem:[%s2602_s10 + $0xd0] sm:$0xff] %v887_v2  ;;  %v1718_v3 = vpop.f32.mrb[44].mxu1  ;;  %1793 = vmatprep.mubr.f32.mxu0 %v887_v2 }
 0x290   : > { %v902_v4 = vadd.f32 %v1718_v3, %v2597_v10  ;;  %v896_v5 = vpop.f32.mrb[45].mxu1  ;;  %1794 = vmatmul.mubr.f32.gmra.mrb[42].mxu0 %v892_v0 }
 0x291   : > { %v897_v6 = vadd.f32 %v2597_v10, %v896_v5 }
 0x292   : > { %944 = vst [vmem:[%s2602_s10 + $0xe8] sm:$0xff] %v902_v4 }
 0x293   : > { %943 = vst [vmem:[%s2602_s10 + $0xe0] sm:$0xff] %v897_v6  ;;  %v1721_v7 = vpop.f32.mrb[46].mxu1  ;;  %1796 = vmatprep.mubr.f32.mxu0 %v897_v6 }
 0x294   : > { %v912_v8 = vadd.f32 %v1721_v7, %v2597_v10  ;;  %v906_v9 = vpop.f32.mrb[47].mxu1  ;;  %1797 = vmatmul.mubr.f32.gmra.mrb[44].mxu0 %v902_v4 }
 0x295   : > { %v907_v11 = vadd.f32 %v2597_v10, %v906_v9 }
 0x296   : > { %946 = vst [vmem:[%s2602_s10 + $0xf8] sm:$0xff] %v912_v8 }
 0x297   : > { %945 = vst [vmem:[%s2602_s10 + $0xf0] sm:$0xff] %v907_v11  ;;  %1799 = vmatprep.mubr.f32.mxu0 %v907_v11 }
 0x298   : > { %1800 = vmatmul.mubr.f32.gmra.mrb[46].mxu0 %v912_v8 }
 0x299   : > { %2127 = shalt.err (!%p2124_p4)
}
 0x29a   : > { %s2128_s13 = scalar_lea.hbm %s2672_s21, 4096  ;;  %s2132_s12 = scalar_lea.hbm %s2801_s7, 8192 }
 0x29b   : > { %p2129_p9 = scmp.ne.s32.totalorder %s2672_s21, %s2128_s13  ;;  %p2133_p8 = scmp.lt.u32.totalorder %s2672_s21, %s2801_s7 }
 0x29c   : > { %p2134_p13 = scmp.lt.u32.totalorder %s2132_s12, %s2128_s13  ;;  %p2136_p10 = scmp.lt.u32.totalorder %s2128_s13, %s2672_s21 }
 0x29d   : > { %p2130_p0 = pnand %p2129_p9, %p2426_p5 }
 0x29e   : > { %p2135_p6 = por %p2134_p13, %p2133_p8 }
 0x29f   : > { %p2131_p11 = pneg %p2130_p0 }
 0x2a0   : > { %p2137_p3 = por %p2136_p10, %p2135_p6 }
 0x2a2   : > { %p2138_p7 = pnand %p2137_p3, %p2131_p11 }
 0x2a4   : > { %2141 = shalt.err (!%p2138_p7)
}
 0x2a5   : > { %s2229_s8 = smov 128   ;;  %s2230_s30 = smov 8  }
 0x2a6   : > { %1929 = dma.vmem_to_hbm [thread:$0]  (%p2426_p5), %s2675_s16, 4096, %s2672_s21, %s1226_s29, %s2229_s8, %s2229_s8, %s2230_s30  }
 0x2a7   : > { %s2705_s9 = scalar_lea.vmem [#allocation10], %s2480_s23  ;;  %s2743_s29 = scalar_lea.hbm %s2800_s6, %s1416_s14 }
 0x2a8   : > { %s1239_s23 = sshll.u32 %s2705_s9, 4  ;;  %s1221_s13 = scalar_lea.sflag [#allocation4], %s2477_s17  ;;  %s2745_s23 = int_to_ptr.vmem [resolvable:$true] %s1239_s23 }
 0x2a9   : > { %s2142_s15 = scalar_lea.vmem %s2745_s23, 4096  ;;  %s2231_s28 = smov [#allocation10]  }
 0x2aa   : > { %p2143_p12 = scmp.ne.s32.totalorder %s2745_s23, %s2142_s15  ;;  %s2146_s10 = sshll.u32 %s2231_s28, 4  ;;  %s2147_s10 = int_to_ptr.vmem [resolvable:$false] %s2146_s10 }
 0x2ab   : > { %s2148_s12 = scalar_lea.vmem %s2147_s10, 8192  ;;  %p2149_p4 = scmp.lt.s32.totalorder %s2745_s23, %s2147_s10 }
 0x2ac   : > { %p2144_p1 = pnand %p2143_p12, %p2426_p5  ;;  %p2150_p9 = scmp.lt.s32.totalorder %s2148_s12, %s2142_s15 }
 0x2ae   : > { %p2145_p2 = pneg %p2144_p1  ;;  %p2151_p0 = por %p2150_p9, %p2149_p4 }
 0x2b0   : > { %p2152_p11 = pnand %p2151_p0, %p2145_p2 }
 0x32f   : > { %v1756_v10 = vpop.f32.mrb[16].mxu0 }
 0x330   : > { %1189 = vst [vmem:[%s2705_s9 + $0x8] sm:$0xff] %v1756_v10  ;;  %v1029_v12 = vpop.f32.mrb[17].mxu0 }
 0x331   : > { %1188 = vst [vmem:[%s2705_s9] sm:$0xff] %v1029_v12 }
 0x333   : > { %v1759_v13 = vpop.f32.mrb[18].mxu0 }
 0x334   : > { %1191 = vst [vmem:[%s2705_s9 + $0x18] sm:$0xff] %v1759_v13  ;;  %v1039_v37 = vpop.f32.mrb[19].mxu0 }
 0x335   : > { %1190 = vst [vmem:[%s2705_s9 + $0x10] sm:$0xff] %v1039_v37 }
 0x337   : > { %v1762_v14 = vpop.f32.mrb[20].mxu0 }
 0x338   : > { %1193 = vst [vmem:[%s2705_s9 + $0x28] sm:$0xff] %v1762_v14  ;;  %v1049_v15 = vpop.f32.mrb[21].mxu0 }
 0x339   : > { %1192 = vst [vmem:[%s2705_s9 + $0x20] sm:$0xff] %v1049_v15 }
 0x33b   : > { %v1765_v16 = vpop.f32.mrb[22].mxu0 }
 0x33c   : > { %1195 = vst [vmem:[%s2705_s9 + $0x38] sm:$0xff] %v1765_v16  ;;  %v1059_v17 = vpop.f32.mrb[23].mxu0 }
 0x33d   : > { %1194 = vst [vmem:[%s2705_s9 + $0x30] sm:$0xff] %v1059_v17 }
 0x33f   : > { %v1768_v18 = vpop.f32.mrb[24].mxu0 }
 0x340   : > { %1197 = vst [vmem:[%s2705_s9 + $0x48] sm:$0xff] %v1768_v18  ;;  %v1069_v19 = vpop.f32.mrb[25].mxu0 }
 0x341   : > { %1196 = vst [vmem:[%s2705_s9 + $0x40] sm:$0xff] %v1069_v19 }
 0x343   : > { %v1771_v20 = vpop.f32.mrb[26].mxu0 }
 0x344   : > { %1199 = vst [vmem:[%s2705_s9 + $0x58] sm:$0xff] %v1771_v20  ;;  %v1079_v21 = vpop.f32.mrb[27].mxu0 }
 0x345   : > { %1198 = vst [vmem:[%s2705_s9 + $0x50] sm:$0xff] %v1079_v21 }
 0x347   : > { %v1774_v22 = vpop.f32.mrb[28].mxu0 }
 0x348   : > { %1201 = vst [vmem:[%s2705_s9 + $0x68] sm:$0xff] %v1774_v22  ;;  %v1089_v23 = vpop.f32.mrb[29].mxu0 }
 0x349   : > { %1200 = vst [vmem:[%s2705_s9 + $0x60] sm:$0xff] %v1089_v23 }
 0x34b   : > { %v1777_v24 = vpop.f32.mrb[30].mxu0 }
 0x34c   : > { %1203 = vst [vmem:[%s2705_s9 + $0x78] sm:$0xff] %v1777_v24  ;;  %v1099_v25 = vpop.f32.mrb[31].mxu0 }
 0x34d   : > { %1202 = vst [vmem:[%s2705_s9 + $0x70] sm:$0xff] %v1099_v25 }
 0x34f   : > { %v1780_v26 = vpop.f32.mrb[32].mxu0 }
 0x350   : > { %1205 = vst [vmem:[%s2705_s9 + $0x88] sm:$0xff] %v1780_v26  ;;  %v1109_v27 = vpop.f32.mrb[33].mxu0 }
 0x351   : > { %1204 = vst [vmem:[%s2705_s9 + $0x80] sm:$0xff] %v1109_v27 }
 0x353   : > { %v1783_v28 = vpop.f32.mrb[34].mxu0 }
 0x354   : > { %1207 = vst [vmem:[%s2705_s9 + $0x98] sm:$0xff] %v1783_v28  ;;  %v1119_v29 = vpop.f32.mrb[35].mxu0 }
 0x355   : > { %1206 = vst [vmem:[%s2705_s9 + $0x90] sm:$0xff] %v1119_v29 }
 0x357   : > { %v1786_v30 = vpop.f32.mrb[36].mxu0 }
 0x358   : > { %1209 = vst [vmem:[%s2705_s9 + $0xa8] sm:$0xff] %v1786_v30  ;;  %v1129_v31 = vpop.f32.mrb[37].mxu0 }
 0x359   : > { %1208 = vst [vmem:[%s2705_s9 + $0xa0] sm:$0xff] %v1129_v31 }
 0x35b   : > { %v1789_v32 = vpop.f32.mrb[38].mxu0 }
 0x35c   : > { %1211 = vst [vmem:[%s2705_s9 + $0xb8] sm:$0xff] %v1789_v32  ;;  %v1139_v33 = vpop.f32.mrb[39].mxu0 }
 0x35d   : > { %1210 = vst [vmem:[%s2705_s9 + $0xb0] sm:$0xff] %v1139_v33 }
 0x35f   : > { %v1792_v34 = vpop.f32.mrb[40].mxu0 }
 0x360   : > { %1213 = vst [vmem:[%s2705_s9 + $0xc8] sm:$0xff] %v1792_v34  ;;  %v1149_v35 = vpop.f32.mrb[41].mxu0 }
 0x361   : > { %1212 = vst [vmem:[%s2705_s9 + $0xc0] sm:$0xff] %v1149_v35 }
 0x363   : > { %v1795_v36 = vpop.f32.mrb[42].mxu0 }
 0x364   : > { %1215 = vst [vmem:[%s2705_s9 + $0xd8] sm:$0xff] %v1795_v36  ;;  %v1159_v38 = vpop.f32.mrb[43].mxu0 }
 0x365   : > { %1214 = vst [vmem:[%s2705_s9 + $0xd0] sm:$0xff] %v1159_v38 }
 0x367   : > { %v1798_v40 = vpop.f32.mrb[44].mxu0 }
 0x368   : > { %1217 = vst [vmem:[%s2705_s9 + $0xe8] sm:$0xff] %v1798_v40  ;;  %v1169_v41 = vpop.f32.mrb[45].mxu0 }
 0x369   : > { %1216 = vst [vmem:[%s2705_s9 + $0xe0] sm:$0xff] %v1169_v41 }
 0x36b   : > { %v1801_v43 = vpop.f32.mrb[46].mxu0 }
 0x36c   : > { %1219 = vst [vmem:[%s2705_s9 + $0xf8] sm:$0xff] %v1801_v43  ;;  %v1179_v44 = vpop.f32.mrb[47].mxu0 }
 0x36d   : > { %1218 = vst [vmem:[%s2705_s9 + $0xf0] sm:$0xff] %v1179_v44 }
 0x36e   : > { %2155 = shalt.err (!%p2152_p11)
}
 0x36f   : > { %s2156_s14 = scalar_lea.hbm %s2743_s29, 4096  ;;  %s2160_s9 = scalar_lea.hbm %s2800_s6, 8192 }
 0x370   : > { %p2157_p8 = scmp.ne.s32.totalorder %s2743_s29, %s2156_s14  ;;  %p2161_p10 = scmp.lt.u32.totalorder %s2743_s29, %s2800_s6 }
 0x371   : > { %p2162_p3 = scmp.lt.u32.totalorder %s2160_s9, %s2156_s14  ;;  %p2164_p12 = scmp.lt.u32.totalorder %s2156_s14, %s2743_s29 }
 0x372   : > { %p2158_p13 = pnand %p2157_p8, %p2426_p5 }
 0x373   : > { %p2163_p7 = por %p2162_p3, %p2161_p10 }
 0x374   : > { %p2159_p6 = pneg %p2158_p13 }
 0x375   : > { %p2165_p1 = por %p2164_p12, %p2163_p7 }
 0x377   : > { %p2166_p2 = pnand %p2165_p1, %p2159_p6 }
 0x379   : > { %2169 = shalt.err (!%p2166_p2)
}
 0x37a   : > { %1928 = dma.vmem_to_hbm [thread:$0]  (%p2426_p5), %s2745_s23, 4096, %s2743_s29, %s1221_s13, %s2229_s8, %s2229_s8, %s2230_s30  }
 0x37b PF: > { %s2821_s15 = sld [smem:[#allocation18_spill]]  ;;  %s1270_s28 = sand.u32 1, %s2208_s24  }
 0x37c   : > { %p2823_p9 = scmp.ge.s32.totalorder %s2220_s27, 2  ;;  %s1271_s10 = scalar_lea.sflag [#allocation4], %s1270_s28 }
 0x381   : > { %p2822_p4 = scmp.ne.s32.totalorder %s2821_s15, 0 }
 0x383   : > { %p1947_p0 = pnand %p2823_p9, %p2822_p4 }
 0x385   : > { %2199 = dma.done.wait (!%p1947_p0), %s1271_s10, 4096  }
 0x386   : > { %2201 = vsyncadd (!%p1947_p0), %s1271_s10, 4294963200  ;;  %s1280_s19 = scalar_lea.sflag [#allocation12], %s1270_s28 }
 0x387   : > { %2203 = dma.done.wait (!%p1947_p0), %s1280_s19, 4096  }
 0x388   : > { %2205 = vsyncadd (!%p1947_p0), %s1280_s19, 4294963200  ;;  %p26_p5 = scmp.ge.s32.totalorder %s2412_s22, 4   ;;  %s2824_s24 = smov %s2212_s25 }
 0x389   : > { %s2825_s25 = smov %s2216_s26  ;;  %s2826_s26 = smov %s2422_s18 }
 0x38a   : > { %s2827_s27 = smov %s2412_s22  ;;  %28 = sbr.rel (!%p26_p5) target bundleno = 9 (0x9), region = 118 }
 0x391   :  { %1285 = vsyncpa [#allocation3], 1 }
 0x392   :  { %1287 = vsyncpa [#allocation3 + $0x1], 1 }
 0x393   :  { %1288 = vsyncpa [#allocation6], 1 }
 0x394   :  { %1289 = vsyncpa [#allocation9], 1 }
 0x395   :  { %1290 = vsyncpa [#allocation4], 1 }
 0x396   :  { %1292 = vsyncpa [#allocation4 + $0x1], 1 }
 0x397   :  { %1293 = vsyncpa [#allocation12], 1 }
 0x398   :  { %1295 = vsyncpa [#allocation12 + $0x1], 1 }

</bundles_post_ra>
